<compile_context>
chip_gen: v6e
topology: v6e:2x2x1
jax: 0.10.0
libtpu: 0.0.40
codegen_flags: <defaults>
</compile_context>

<pallas_src>
import functools

import jax
import jax.numpy as jnp
from jax.experimental import pallas as pl
from jax.experimental.pallas import tpu as pltpu

EPS = 1e-5  # PyTorch BatchNorm1d default


def _pick_tile(n, target=512):
    """Largest 128-multiple tile <= target that divides n, else the full n."""
    if n <= target:
        return n
    t = (target // 128) * 128
    while t >= 128:
        if n % t == 0:
            return t
        t -= 128
    return n


# --------------------------------------------------------------------------
# Pass 0: per-channel sum / sum-of-squares of x (for BN1 batch statistics).
# Grid: (N parallel, L-tiles arbitrary); per-batch accumulators finalized by
# the standard resident-output-block pattern.
# --------------------------------------------------------------------------
def _x_stats_kernel(x_ref, sum_ref, sq_ref):
    t = pl.program_id(1)

    @pl.when(t == 0)
    def _():
        sum_ref[...] = jnp.zeros_like(sum_ref)
        sq_ref[...] = jnp.zeros_like(sq_ref)

    xb = x_ref[0]                                             # (C, TLx)
    sum_ref[...] += jnp.sum(xb, axis=-1, keepdims=True)[None]
    sq_ref[...] += jnp.sum(xb * xb, axis=-1, keepdims=True)[None]


# --------------------------------------------------------------------------
# Shared helpers for the conv kernels.
# --------------------------------------------------------------------------
def _build_hpad(x_ref, s1_ref, t1_ref, hp_ref, *, C, L2, pad_left, pad_right):
    """hp = zero-padded relu(bn1(x_up)) for the current batch element."""
    h = jnp.maximum(x_ref[0] * s1_ref[...] + t1_ref[...], 0.0)  # (C, L2)
    if pad_left > 0:
        hp_ref[:, :pad_left] = jnp.zeros((C, pad_left), jnp.float32)
    if pad_right > 0:
        hp_ref[:, pad_left + L2:] = jnp.zeros((C, pad_right), jnp.float32)
    hp_ref[:, pl.ds(pad_left, L2)] = h


def _conv_tile(hp_ref, w_ref, b_ref, t, *, K, TL2):
    """One (F, TL2) output tile: bias + sum_k W_k @ hp[:, T0+k : T0+k+TL2]."""
    T0 = t * TL2
    if TL2 % 128 == 0:
        T0 = pl.multiple_of(T0, 128)
    win = hp_ref[:, pl.ds(T0, TL2 + K - 1)]                   # (C, TL2+K-1)
    acc = jnp.dot(w_ref[0], win[:, 0:TL2], preferred_element_type=jnp.float32)
    for k in range(1, K):
        acc = acc + jnp.dot(w_ref[k], win[:, k:k + TL2],
                            preferred_element_type=jnp.float32)
    return acc + b_ref[...]                                   # (F, TL2)


# --------------------------------------------------------------------------
# Pass 1: conv -> per-channel sum / sumsq of y (for BN2 batch statistics).
# --------------------------------------------------------------------------
def _conv_stats_kernel(x_ref, s1_ref, t1_ref, w_ref, b_ref,
                       ysum_ref, ysq_ref, hp_ref,
                       *, K, C, L2, TL2, pad_left, pad_right):
    t = pl.program_id(1)

    @pl.when(t == 0)
    def _():
        _build_hpad(x_ref, s1_ref, t1_ref, hp_ref, C=C, L2=L2,
                    pad_left=pad_left, pad_right=pad_right)
        ysum_ref[...] = jnp.zeros_like(ysum_ref)
        ysq_ref[...] = jnp.zeros_like(ysq_ref)

    y = _conv_tile(hp_ref, w_ref, b_ref, t, K=K, TL2=TL2)
    ysum_ref[...] += jnp.sum(y, axis=-1, keepdims=True)[None]
    ysq_ref[...] += jnp.sum(y * y, axis=-1, keepdims=True)[None]


# --------------------------------------------------------------------------
# Pass 2: conv -> BN2 affine (single FMA) -> ReLU -> lane-dense output tile.
# --------------------------------------------------------------------------
def _conv_apply_kernel(x_ref, s1_ref, t1_ref, w_ref, b_ref, s2_ref, t2_ref,
                       o_ref, hp_ref,
                       *, K, C, L2, TL2, pad_left, pad_right):
    t = pl.program_id(1)

    @pl.when(t == 0)
    def _():
        _build_hpad(x_ref, s1_ref, t1_ref, hp_ref, C=C, L2=L2,
                    pad_left=pad_left, pad_right=pad_right)

    y = _conv_tile(hp_ref, w_ref, b_ref, t, K=K, TL2=TL2)
    o_ref[...] = jnp.maximum(y * s2_ref[...] + t2_ref[...], 0.0)[None]


# --------------------------------------------------------------------------
# Wrapper
# --------------------------------------------------------------------------
def decoder_block_forward(x, conv_w, conv_b, bn1_g, bn1_b, bn2_g, bn2_b,
                          kernel_size):
    """x: (N, C, L) f32.  conv_w: (F, C, K) PyTorch layout.  Returns (N, F, 2L)."""
    N, C, L = x.shape
    F = conv_w.shape[0]
    K = kernel_size
    L2 = 2 * L
    pad_left = (K - 1) // 2
    pad_right = K - 1 - pad_left
    Lp = L2 + K - 1

    x = x.astype(jnp.float32)
    bn1_g = bn1_g.astype(jnp.float32)
    bn1_b = bn1_b.astype(jnp.float32)
    bn2_g = bn2_g.astype(jnp.float32)
    bn2_b = bn2_b.astype(jnp.float32)

    TLx = _pick_tile(L)
    Tx = L // TLx
    TL2 = _pick_tile(L2)
    T = L2 // TL2

    # VMEM budget (re-derived so it also covers v7x's 64 MiB VMEM / raises the
    # default scoped limit on v5e (16 MiB) and v6e (32 MiB) when needed).
    est = 4 * (2 * C * L2 + C * Lp + 2 * F * TL2 + K * F * C + 4 * (C + F))
    vmem_limit = int(min(max(2 * est, 32 * 1024 * 1024), 96 * 1024 * 1024))
    cparams = pltpu.CompilerParams(
        dimension_semantics=("parallel", "arbitrary"),
        vmem_limit_bytes=vmem_limit)

    # ---- pass 0: BN1 batch statistics (stats of x == stats of upsampled x) --
    xsum, xsq = pl.pallas_call(
        _x_stats_kernel,
        out_shape=(jax.ShapeDtypeStruct((N, C, 1), jnp.float32),
                   jax.ShapeDtypeStruct((N, C, 1), jnp.float32)),
        grid=(N, Tx),
        in_specs=[pl.BlockSpec((1, C, TLx), lambda n, t: (n, 0, t))],
        out_specs=(pl.BlockSpec((1, C, 1), lambda n, t: (n, 0, 0)),
                   pl.BlockSpec((1, C, 1), lambda n, t: (n, 0, 0))),
        compiler_params=cparams,
    )(x)

    cnt1 = float(N * L)
    mean1 = jnp.sum(xsum, axis=0)[:, 0] / cnt1
    var1 = jnp.sum(xsq, axis=0)[:, 0] / cnt1 - mean1 ** 2
    sc1 = bn1_g * jax.lax.rsqrt(var1 + EPS)
    sh1 = bn1_b - mean1 * sc1
    s1 = sc1.reshape(C, 1).astype(jnp.float32)
    t1 = sh1.reshape(C, 1).astype(jnp.float32)

    # TODO(synk): fold this nearest x2 upsample into the kernels (lane-stretch
    # gather / strided store) to remove the extra HBM round trip of x_up.
    x_up = jnp.repeat(x, 2, axis=-1)                              # (N, C, L2)
    w_kfc = jnp.transpose(conv_w, (2, 0, 1)).astype(jnp.float32)  # (K, F, C)
    bias = conv_b.reshape(F, 1).astype(jnp.float32)

    def _c2(n, t):
        return (0, 0)

    def _c3(n, t):
        return (0, 0, 0)

    in_specs_common = [
        pl.BlockSpec((1, C, L2), lambda n, t: (n, 0, 0)),  # x_up, resident / n
        pl.BlockSpec((C, 1), _c2),                         # BN1 scale
        pl.BlockSpec((C, 1), _c2),                         # BN1 shift
        pl.BlockSpec((K, F, C), _c3),                      # conv weight (tap-major)
        pl.BlockSpec((F, 1), _c2),                         # conv bias
    ]

    # ---- pass 1: conv -> BN2 batch statistics --------------------------------
    ysum, ysq = pl.pallas_call(
        functools.partial(_conv_stats_kernel, K=K, C=C, L2=L2, TL2=TL2,
                          pad_left=pad_left, pad_right=pad_right),
        out_shape=(jax.ShapeDtypeStruct((N, F, 1), jnp.float32),
                   jax.ShapeDtypeStruct((N, F, 1), jnp.float32)),
        grid=(N, T),
        in_specs=in_specs_common,
        out_specs=(pl.BlockSpec((1, F, 1), lambda n, t: (n, 0, 0)),
                   pl.BlockSpec((1, F, 1), lambda n, t: (n, 0, 0))),
        scratch_shapes=[pltpu.VMEM((C, Lp), jnp.float32)],
        compiler_params=cparams,
    )(x_up, s1, t1, w_kfc, bias)

    cnt2 = float(N * L2)
    mean2 = jnp.sum(ysum, axis=0)[:, 0] / cnt2
    var2 = jnp.sum(ysq, axis=0)[:, 0] / cnt2 - mean2 ** 2
    sc2 = bn2_g * jax.lax.rsqrt(var2 + EPS)
    sh2 = bn2_b - mean2 * sc2
    s2 = sc2.reshape(F, 1).astype(jnp.float32)
    t2 = sh2.reshape(F, 1).astype(jnp.float32)

    # ---- pass 2: conv -> BN2 -> ReLU -> output -------------------------------
    z = pl.pallas_call(
        functools.partial(_conv_apply_kernel, K=K, C=C, L2=L2, TL2=TL2,
                          pad_left=pad_left, pad_right=pad_right),
        out_shape=jax.ShapeDtypeStruct((N, F, L2), jnp.float32),
        grid=(N, T),
        in_specs=in_specs_common + [
            pl.BlockSpec((F, 1), _c2),                     # BN2 scale
            pl.BlockSpec((F, 1), _c2),                     # BN2 shift
        ],
        out_specs=pl.BlockSpec((1, F, TL2), lambda n, t: (n, 0, t)),
        scratch_shapes=[pltpu.VMEM((C, Lp), jnp.float32)],
        compiler_params=cparams,
    )(x_up, s1, t1, w_kfc, bias, s2, t2)
    return z


# --------------------------------------------------------------------------
# Pure-JAX reference matching the PyTorch forward (training-mode BN).
# --------------------------------------------------------------------------
def decoder_block_reference(x, conv_w, conv_b, bn1_g, bn1_b, bn2_g, bn2_b,
                            kernel_size):
    K = kernel_size
    xu = jnp.repeat(x, 2, axis=-1)
    m1 = xu.mean(axis=(0, 2), keepdims=True)
    v1 = ((xu - m1) ** 2).mean(axis=(0, 2), keepdims=True)
    h = (xu - m1) * jax.lax.rsqrt(v1 + EPS) * bn1_g[None, :, None] + bn1_b[None, :, None]
    h = jnp.maximum(h, 0.0)
    pad_left = (K - 1) // 2
    pad_right = K - 1 - pad_left
    y = jax.lax.conv_general_dilated(
        h, conv_w, window_strides=(1,), padding=[(pad_left, pad_right)],
        dimension_numbers=('NCH', 'OIH', 'NCH')) + conv_b[None, :, None]
    m2 = y.mean(axis=(0, 2), keepdims=True)
    v2 = ((y - m2) ** 2).mean(axis=(0, 2), keepdims=True)
    z = (y - m2) * jax.lax.rsqrt(v2 + EPS) * bn2_g[None, :, None] + bn2_b[None, :, None]
    return jnp.maximum(z, 0.0)


if __name__ == "__main__":
    N, in_channels, L = 2, 4, 16
    num_filters, kernel_size = 8, 3

    key = jax.random.PRNGKey(0)
    kx, kw, kb, kg1, kb1, kg2, kb2 = jax.random.split(key, 7)

    x = jax.random.normal(kx, (N, in_channels, L), jnp.float32)

    bound = 1.0 / (in_channels * kernel_size) ** 0.5
    conv_w = jax.random.uniform(kw, (num_filters, in_channels, kernel_size),
                                jnp.float32, -bound, bound)
    conv_b = jax.random.uniform(kb, (num_filters,), jnp.float32, -bound, bound)
    bn1_g = 1.0 + 0.1 * jax.random.normal(kg1, (in_channels,), jnp.float32)
    bn1_b = 0.1 * jax.random.normal(kb1, (in_channels,), jnp.float32)
    bn2_g = 1.0 + 0.1 * jax.random.normal(kg2, (num_filters,), jnp.float32)
    bn2_b = 0.1 * jax.random.normal(kb2, (num_filters,), jnp.float32)

    out = decoder_block_forward(x, conv_w, conv_b, bn1_g, bn1_b, bn2_g, bn2_b,
                                kernel_size)
    out = jax.block_until_ready(out)

    ref = decoder_block_reference(x, conv_w, conv_b, bn1_g, bn1_b, bn2_g, bn2_b,
                                  kernel_size)
    ref = jax.block_until_ready(ref)

    assert out.shape == (N, num_filters, 2 * L), out.shape
    assert jnp.allclose(out, ref, atol=2e-4, rtol=2e-4), (
        float(jnp.max(jnp.abs(out - ref))))

    print("KERNEL_OK")
</pallas_src>

<mosaic_0001>
module attributes {stable_mosaic.version = 11 : i64} {
  func.func @_x_stats_kernel(%arg0: i32, %arg1: i32, %arg2: memref<1x4x16xf32, #tpu.memory_space<vmem>>, %arg3: memref<1x4x1xf32, #tpu.memory_space<vmem>>, %arg4: memref<1x4x1xf32, #tpu.memory_space<vmem>>) attributes {dimension_semantics = [#tpu.dimension_semantics<parallel>, #tpu.dimension_semantics<arbitrary>], iteration_bounds = array<i64: 2, 1>, scalar_prefetch = 0 : i64, scratch_operands = 0 : i64, tpu.core_type = #tpu.core_type<tc>, window_params = [{transform_indices = @transform_0, window_bounds = array<i64: 1, 4, 16>}, {transform_indices = @transform_1, window_bounds = array<i64: 1, 4, 1>}, {transform_indices = @transform_2, window_bounds = array<i64: 1, 4, 1>}]} {
    %c0_i32 = arith.constant 0 : i32
    %0 = arith.cmpi eq, %arg1, %c0_i32 : i32
    %1 = arith.extui %0 : i1 to i32
    %c0_i32_0 = arith.constant 0 : i32
    %2 = arith.cmpi ne, %1, %c0_i32_0 : i32
    scf.if %2 {
      %cst_16 = arith.constant 0.000000e+00 : f32
      %18 = vector.broadcast %cst_16 : f32 to vector<1x4x1xf32>
      %c0_17 = arith.constant 0 : index
      %c0_18 = arith.constant 0 : index
      %c0_19 = arith.constant 0 : index
      %19 = vector.load %arg3[%c0_17, %c0_18, %c0_19] : memref<1x4x1xf32, #tpu.memory_space<vmem>>, vector<1x4x1xf32>
      tpu.vector_store %arg3[%c0_17, %c0_18, %c0_19], %18 {strides = array<i32>} : memref<1x4x1xf32, #tpu.memory_space<vmem>>, vector<1x4x1xf32>,
      %cst_20 = arith.constant 0.000000e+00 : f32
      %20 = vector.broadcast %cst_20 : f32 to vector<1x4x1xf32>
      %c0_21 = arith.constant 0 : index
      %c0_22 = arith.constant 0 : index
      %c0_23 = arith.constant 0 : index
      %21 = vector.load %arg4[%c0_21, %c0_22, %c0_23] : memref<1x4x1xf32, #tpu.memory_space<vmem>>, vector<1x4x1xf32>
      tpu.vector_store %arg4[%c0_21, %c0_22, %c0_23], %20 {strides = array<i32>} : memref<1x4x1xf32, #tpu.memory_space<vmem>>, vector<1x4x1xf32>,
    } else {
    }
    %c0 = arith.constant 0 : index
    %c0_1 = arith.constant 0 : index
    %c0_2 = arith.constant 0 : index
    %3 = vector.load %arg2[%c0, %c0_1, %c0_2] : memref<1x4x16xf32, #tpu.memory_space<vmem>>, vector<1x4x16xf32>
    %4 = vector.shape_cast %3 : vector<1x4x16xf32> to vector<4x16xf32>
    %c0_3 = arith.constant 0 : index
    %c0_4 = arith.constant 0 : index
    %c0_5 = arith.constant 0 : index
    %5 = vector.load %arg3[%c0_3, %c0_4, %c0_5] : memref<1x4x1xf32, #tpu.memory_space<vmem>>, vector<1x4x1xf32>
    %cst = arith.constant dense<0.000000e+00> : vector<4xf32>
    %6 = vector.multi_reduction <add>, %4, %cst [1] : vector<4x16xf32> to vector<4xf32>
    %7 = vector.shape_cast %6 : vector<4xf32> to vector<4x1xf32>
    %8 = vector.shape_cast %7 : vector<4x1xf32> to vector<1x4x1xf32>
    %9 = arith.addf %5, %8 : vector<1x4x1xf32>
    %c0_6 = arith.constant 0 : index
    %c0_7 = arith.constant 0 : index
    %c0_8 = arith.constant 0 : index
    %10 = vector.load %arg3[%c0_6, %c0_7, %c0_8] : memref<1x4x1xf32, #tpu.memory_space<vmem>>, vector<1x4x1xf32>
    tpu.vector_store %arg3[%c0_6, %c0_7, %c0_8], %9 {strides = array<i32>} : memref<1x4x1xf32, #tpu.memory_space<vmem>>, vector<1x4x1xf32>,
    %c0_9 = arith.constant 0 : index
    %c0_10 = arith.constant 0 : index
    %c0_11 = arith.constant 0 : index
    %11 = vector.load %arg4[%c0_9, %c0_10, %c0_11] : memref<1x4x1xf32, #tpu.memory_space<vmem>>, vector<1x4x1xf32>
    %12 = arith.mulf %4, %4 : vector<4x16xf32>
    %cst_12 = arith.constant dense<0.000000e+00> : vector<4xf32>
    %13 = vector.multi_reduction <add>, %12, %cst_12 [1] : vector<4x16xf32> to vector<4xf32>
    %14 = vector.shape_cast %13 : vector<4xf32> to vector<4x1xf32>
    %15 = vector.shape_cast %14 : vector<4x1xf32> to vector<1x4x1xf32>
    %16 = arith.addf %11, %15 : vector<1x4x1xf32>
    %c0_13 = arith.constant 0 : index
    %c0_14 = arith.constant 0 : index
    %c0_15 = arith.constant 0 : index
    %17 = vector.load %arg4[%c0_13, %c0_14, %c0_15] : memref<1x4x1xf32, #tpu.memory_space<vmem>>, vector<1x4x1xf32>
    tpu.vector_store %arg4[%c0_13, %c0_14, %c0_15], %16 {strides = array<i32>} : memref<1x4x1xf32, #tpu.memory_space<vmem>>, vector<1x4x1xf32>,
    return
  }
  func.func @transform_0(%arg0: i32, %arg1: i32) -> (i32, i32, i32) {
    %c0_i32 = arith.constant 0 : i32
    %c0_i32_0 = arith.constant 0 : i32
    return %arg0, %c0_i32, %arg1 : i32, i32, i32
  }
  func.func @transform_1(%arg0: i32, %arg1: i32) -> (i32, i32, i32) {
    %c0_i32 = arith.constant 0 : i32
    %c0_i32_0 = arith.constant 0 : i32
    %c0_i32_1 = arith.constant 0 : i32
    return %arg0, %c0_i32, %c0_i32_0 : i32, i32, i32
  }
  func.func @transform_2(%arg0: i32, %arg1: i32) -> (i32, i32, i32) {
    %c0_i32 = arith.constant 0 : i32
    %c0_i32_0 = arith.constant 0 : i32
    %c0_i32_1 = arith.constant 0 : i32
    return %arg0, %c0_i32, %c0_i32_0 : i32, i32, i32
  }
}

</mosaic_0001>

<bundles_post_ra>
// kernel: tpu_custom_call.1
= control target key start
LH: loop header
LB: loop body
LE: loop exit
PB: predicated region body
PF: predicated region fallthrough
CT: control target
= control target key end

     0   :  { %8 = vsyncpa [#allocation3], 0  ;;  %s585_s0 = inlined_call_operand.hbm [shape: f32[2,4,16], index: 0, kind: input, shape index: {}]   ;;  %s586_s1 = inlined_call_operand.vmem [shape: f32[2,4,1], index: 1, kind: output, shape index: {0}]   ;;  %s587_s2 = inlined_call_operand.vmem [shape: f32[2,4,1], index: 2, kind: output, shape index: {1}]  }
   0x1   :  { %10 = vsyncpa [#allocation3 + $0x1], 0  ;;  %s478_s9 = smov 0   ;;  %s480_s10 = smov 0  }
   0x2   :  { %s482_s11 = smov 0   ;;  %s484_s12 = smov 0  }
   0x3   :  { %s486_s13 = smov 0   ;;  %s488_s14 = smov 0  }
   0x4 LB: > { %s313_s15 = sadd.s32 4294967295, %s459_s14   ;;  %s28_s16 = sadd.s32 1, %s455_s13  ;;  %s459_s14 = sphi %s488_s14, %s16_s14   ;;  %s455_s13 = sphi %s486_s13, %s595_s13   ;;  %s451_s12 = sphi %s484_s12, %s594_s12   ;;  %s447_s11 = sphi %s482_s11, %s593_s11   ;;  %s443_s10 = sphi %s480_s10, %s592_s10   ;;  %s439_s9 = sphi %s478_s9, %s591_s9  }
   0x5   : > { %p30_p0 = scmp.ge.s32.totalorder %s28_s16, 2  ;;  %s37_s17 = sadd.s32 1, %s447_s11 }
   0x6   : > { %p44_p1 = scmp.ne.s32.totalorder %s447_s11, %s443_s10  ;;  %p45_p2 = scmp.eq.s32.totalorder %s459_s14, 0 }
   0x7   : > { %s597_s16 = smov (%p30_p0, %s28_s16), 0  ;;  %p50_p4 = scmp.ne.s32.totalorder %s443_s10, %s439_s9 }
   0x8   : > { %p514_p3 = por %p45_p2, %p44_p1  ;;  %s32_s19 = ssub.s32 %s455_s13, %s597_s16 }
   0x9   : > { %p51_p5 = scmp.eq.s32.totalorder %s313_s15, 0  ;;  %p35_p6 = scmp.eq.s32.totalorder %s32_s19, 0 }
   0xa   : > { %p331_p8 = scmp.lt.s32.totalorder %s459_s14, 2  ;;  %s126_s22 = sand.u32 1, %s447_s11  }
   0xb   : > { %p521_p7 = por %p51_p5, %p50_p4  ;;  %s318_s23 = sshll.u32 %s455_s13, 6 }
   0xc   : > { %s527_s21 = scalar_select %p35_p6, %s447_s11, %s37_s17  }
   0xd   : > { %s317_s24 = sshll.u32 %s126_s22, 2  ;;  %s136_s27 = scalar_lea.hbm %s585_s0, %s318_s23 }
   0xe   : > { %s130_s28 = scalar_lea.vmem [#allocation2], %s317_s24  ;;  %p536_p9 = pnand %p331_p8, %p514_p3 }
   0xf   : > { %s138_s29 = sshll.u32 %s130_s28, 4  ;;  %p319_p10 = scmp.ge.s32.totalorder %s459_s14, 1  ;;  %s139_s29 = int_to_ptr.vmem [resolvable:$true] %s138_s29 }
  0x10   : > { %p143_p11 = scmp.lt.s32.totalorder %s459_s14, 3  ;;  %s127_s3 = scalar_lea.sflag [#allocation3], %s126_s22 }
  0x11   : > { %p383_p12 = pneg %p536_p9  ;;  %s394_s4 = scalar_lea.vmem %s139_s29, 64 }
  0x12   : > { %p395_p13 = scmp.ne.s32.totalorder %s139_s29, %s394_s4  ;;  %s461_s5 = smov [#allocation2]  }
  0x13   : > { %s399_s6 = sshll.u32 %s461_s5, 4  ;;  %s400_s6 = int_to_ptr.vmem [resolvable:$false] %s399_s6 }
  0x14   : > { %p397_p0 = pnand %p395_p13, %p383_p12  ;;  %s401_s7 = scalar_lea.vmem %s400_s6, 128 }
  0x15   : > { %p402_p2 = scmp.lt.s32.totalorder %s139_s29, %s400_s6  ;;  %p403_p3 = scmp.lt.s32.totalorder %s401_s7, %s394_s4 }
  0x16   : > { %p398_p1 = pneg %p397_p0 }
  0x17   : > { %p404_p4 = por %p403_p3, %p402_p2 }
  0x19   : > { %p405_p5 = pnand %p404_p4, %p398_p1 }
  0x1b   : > { %408 = shalt.err (!%p405_p5)
}
  0x1c   : > { %330 = dma.hbm_to_vmem [thread:$0]  (!%p536_p9), %s136_s27, 64, %s139_s29, %s127_s3  }
  0x1d   : > { %p144_p6 = pnand %p319_p10, %p143_p11 }
  0x1e   : > { %s149_s8 = sand.u32 (!%p144_p6), 1, %s443_s10  }
  0x1f   : > { %147 = sbr.rel (%p144_p6) target bundleno = 185 (0xb9), region = 24  ;;  %s320_s9 = sshll.u32 (!%p144_p6), %s149_s8, 2 }
  0x20   : > { %s150_s15 = scalar_lea.sflag (!%p144_p6), [#allocation3], %s149_s8  ;;  %s153_s17 = scalar_lea.vmem (!%p144_p6), [#allocation2], %s320_s9 }
  0x24   : > { %434 = dma.done.wait (%p521_p7), %s150_s15, 64  }
  0x25   : > { %436 = vsyncadd (%p521_p7), %s150_s15, 4294967232  ;;  %p177_p8 = scmp.lt.s32.totalorder %s451_s12, 1  ;;  %vm189_vm0 = vcmask 3072   ;;  %vm194_vm1 = vcmask 125952   ;;  %v462_v0 = vmov 0.0  }
  0x26   : > { %v192_v1 = vld [vmem:[%s153_s17] sm:$0xf] }
  0x27   : > { %s599_s12 = smov (!%p177_p8, %s451_s12), 1  ;;  %v195_v2 = vsel %vm194_vm1, %v192_v1, 0.0  ;;  %v202_v3 = vmul.f32 %v192_v1, %v192_v1 }
  0x28   : > { %s321_s18 = sshll.u32 %s599_s12, 2  ;;  %196 = vadd.xlane.f32.xlu0 %v195_v2 }
  0x29   : > { %s180_s23 = scalar_lea.vmem %s586_s1, %s321_s18  ;;  %v203_v4 = vsel %vm194_vm1, %v202_v3, 0.0  ;;  %s184_s25 = scalar_lea.vmem %s587_s2, %s321_s18 }
  0x2a   : > { %190 = vst.msk [vmem:[%s180_s23] sm:$0xf] %vm189_vm0, %v462_v0  ;;  %191 = vst.msk [vmem:[%s184_s25] sm:$0xf] %vm189_vm0, %v462_v0 }
  0x2c   : > { %204 = vadd.xlane.f32.xlu0 %v203_v4 }
  0x31   : > { %v193_v5 = vld [vmem:[%s180_s23] sm:$0xf] }
  0x32   : > { %v201_v8 = vld [vmem:[%s184_s25] sm:$0xf] }
  0xb1   : > { %v197_v6 = vpop.xlane.xlu0 %196 }
  0xb2   : > { %v198_v7 = vadd.f32 %v197_v6, %v193_v5 }
  0xb4   : > { %200 = vst.msk [vmem:[%s180_s23] sm:$0xf] %vm189_vm0, %v198_v7 }
  0xb5   : > { %v205_v9 = vpop.xlane.xlu0 %204 }
  0xb6   : > { %v206_v10 = vadd.f32 %v205_v9, %v201_v8 }
  0xb8   : > { %207 = vst.msk [vmem:[%s184_s25] sm:$0xf] %vm189_vm0, %v206_v10 }
  0xb9 PF: > { %s16_s14 = sadd.s32 1, %s459_s14   ;;  %s591_s9 = smov %s443_s10 }
  0xba   : > { %p13_p7 = scmp.ge.s32.totalorder %s16_s14, 4   ;;  %s592_s10 = smov %s447_s11 }
  0xbb   : > { %s593_s11 = smov %s527_s21  ;;  %s594_s12 = smov %s455_s13 }
  0xbc   : > { %s595_s13 = smov %s597_s16  ;;  %15 = sbr.rel (!%p13_p7) target bundleno = 4 (0x4), region = 80 }
  0xc1   :  { %241 = vsyncpa [#allocation3], 1 }
  0xc2   :  { %243 = vsyncpa [#allocation3 + $0x1], 1 }

</bundles_post_ra>
